<compile_context>
chip_gen: v7x
topology: tpu7x:2x2x1
jax: 0.10.0
libtpu: 0.0.40
codegen_flags: <defaults>
</compile_context>

<pallas_src>
import functools
import math

import jax
import jax.numpy as jnp
from jax import lax
from jax.experimental import pallas as pl
from jax.experimental.pallas import tpu as pltpu


def _head_kernel(x_ref, wkqv_ref, o_ref, *, batch_block, seq_len, head_pad):
    """One grid step == `batch_block` batch elements.

    x_ref    : (batch_block * T, C)   flattened input rows
    wkqv_ref : (C, 3 * Hp)            fused [Wk | Wq*scale | Wv], transposed + padded
    o_ref    : (batch_block * T, Hp)  attention output (padded head dim)
    """
    bb, T, Hp = batch_block, seq_len, head_pad

    x = x_ref[...]                      # keep native dtype for the MXU
    mxu_dtype = x.dtype                 # bf16 input -> bf16-in/f32-acc path

    # One fused projection matmul, f32 accumulation; 128-aligned lane slices
    # split K/Q/V for free (no repack).
    kqv = jnp.dot(x, wkqv_ref[...], preferred_element_type=jnp.float32)
    k = kqv[:, 0 * Hp:1 * Hp]
    q = kqv[:, 1 * Hp:2 * Hp]           # 1/sqrt(head_size) folded into Wq
    v = kqv[:, 2 * Hp:3 * Hp]

    # (bb*T, Hp) -> (bb, T, Hp): free relayout when T is a multiple of 8.
    k3 = k.reshape(bb, T, Hp)
    q3 = q.reshape(bb, T, Hp)
    v3 = v.reshape(bb, T, Hp)

    # Scores: contract the head axes directly (no in-kernel k transpose).
    s = jnp.einsum("bqh,bkh->bqk",
                   q3.astype(mxu_dtype), k3.astype(mxu_dtype),
                   preferred_element_type=jnp.float32)        # (bb, T, T)

    # Causal mask before exp (exp of the large-negative fill underflows to 0).
    row = lax.broadcasted_iota(jnp.int32, (1, T, T), 1)
    col = lax.broadcasted_iota(jnp.int32, (1, T, T), 2)
    s = jnp.where(col <= row, s, jnp.float32(-1e30))

    # Numerically-stable softmax in f32; EXACT reciprocal (approx=True was
    # ~1e-3 relative error and failed the correctness tolerance).
    m = jnp.max(s, axis=-1, keepdims=True)
    e = jnp.exp(s - m)
    denom = jnp.sum(e, axis=-1, keepdims=True)
    inv = pl.reciprocal(denom, approx=False)                  # (bb, T, 1)

    # Dropout: eval mode -> identity.

    if T > Hp:
        # Normalize after PV: broadcast multiply hits the (bb,T,Hp) output
        # instead of the (bb,T,T) score matrix (VPU work cut by T/Hp).
        out = jnp.einsum("bqk,bkh->bqh",
                         e.astype(mxu_dtype), v3.astype(mxu_dtype),
                         preferred_element_type=jnp.float32) * inv
    else:
        p = e * inv
        out = jnp.einsum("bqk,bkh->bqh",
                         p.astype(mxu_dtype), v3.astype(mxu_dtype),
                         preferred_element_type=jnp.float32)

    o_ref[...] = out.reshape(bb * T, Hp).astype(o_ref.dtype)


def prepare_head_weights(w_key, w_query, w_value, head_pad, dtype):
    """Fuse [Wk | Wq*scale | Wv] into one (C, 3*Hp) operand.

    Hoist / jit this once if the head is called repeatedly with fixed weights.
    Zero columns in Wk/Wq don't change q @ k^T; zero columns in Wv only add
    zero output columns that the wrapper slices off.
    """
    H = w_key.shape[0]
    scale = jnp.float32(1.0 / math.sqrt(H))

    def prep(w, s=None):
        wt = w.astype(jnp.float32).T                 # (C, H)
        if s is not None:
            wt = wt * s                              # fold attention scale
        if head_pad != H:
            wt = jnp.pad(wt, ((0, 0), (0, head_pad - H)))
        return wt.astype(dtype)

    return jnp.concatenate(
        [prep(w_key), prep(w_query, scale), prep(w_value)], axis=1)


def head_forward(x, w_key, w_query, w_value, *, batch_block=None):
    """Single attention head (eval mode).

    x                  : (B, T, C)
    w_key/query/value  : (H, C)   -- PyTorch nn.Linear weight layout
    returns            : (B, T, H)
    """
    B, T, C = x.shape
    H = w_key.shape[0]

    # Lane-dense padded head dim (multiple of 128) -> plain vst, full MXU rows.
    Hp = 128 * pl.cdiv(H, 128)

    if batch_block is None:
        # >= 2 grid steps so BlockSpec software pipelining is active and both
        # v7x TensorCores get a "parallel" step; keep >= ~512 rows per step
        # when the batch allows it.
        bb = max(1, min(B // 2, max(1, 512 // T)))
        while B % bb:
            bb -= 1
        batch_block = bb
    assert B % batch_block == 0
    nb = B // batch_block
    rows = batch_block * T

    wkqv = prepare_head_weights(w_key, w_query, w_value, Hp, x.dtype)
    x_flat = x.reshape(B * T, C)

    kernel = functools.partial(_head_kernel, batch_block=batch_block,
                               seq_len=T, head_pad=Hp)

    grid_spec = pltpu.PrefetchScalarGridSpec(
        num_scalar_prefetch=0,
        grid=(nb,),
        in_specs=[
            pl.BlockSpec((rows, C), lambda i: (i, 0)),     # x rows, pipelined
            pl.BlockSpec((C, 3 * Hp), lambda i: (0, 0)),   # fused weights
        ],
        out_specs=pl.BlockSpec((rows, Hp), lambda i: (i, 0)),
    )

    in_sz = jnp.dtype(x.dtype).itemsize
    # Rough per-step VMEM: double-buffered IO + f32 intermediates.
    est = (2 * rows * C * in_sz            # x (double buffered)
           + 2 * C * 3 * Hp * in_sz        # fused weights
           + 2 * rows * Hp * in_sz         # output (double buffered)
           + 4 * rows * 3 * Hp * 4         # kqv + k/q/v f32 views
           + 3 * batch_block * T * T * 4   # scores / e / p f32
           + rows * Hp * 4)                # out f32 before cast
    vmem_limit = int(min(max(2 * est, 32 << 20), 64 << 20))  # v7x physical 64 MiB

    # Advisory cost (counts the padded Hp head dim on purpose).
    cost = pl.CostEstimate(
        flops=int(2 * B * T * Hp * (3 * C + 2 * T)),
        transcendentals=int(B * T * (T + 1)),
        bytes_accessed=int(in_sz * (B * T * C + 3 * C * Hp + B * T * Hp)),
    )

    out = pl.pallas_call(
        kernel,
        out_shape=jax.ShapeDtypeStruct((B * T, Hp), x.dtype),
        grid_spec=grid_spec,
        compiler_params=pltpu.CompilerParams(
            dimension_semantics=("parallel",),
            vmem_limit_bytes=vmem_limit),
        cost_estimate=cost,
    )(x_flat, wkqv)

    # (B*T, Hp) -> (B, T, Hp) is a free row-major reshape; drop the padding.
    return out.reshape(B, T, Hp)[:, :, :H]


def head_reference(x, w_key, w_query, w_value):
    """Pure-JAX f32 reference matching the PyTorch forward (eval mode)."""
    B, T, C = x.shape
    H = w_key.shape[0]
    xf = x.astype(jnp.float32)
    k = xf @ w_key.astype(jnp.float32).T
    q = xf @ w_query.astype(jnp.float32).T
    v = xf @ w_value.astype(jnp.float32).T
    wei = (q @ jnp.swapaxes(k, -2, -1)) * (H ** -0.5)
    tril = jnp.tril(jnp.ones((T, T), dtype=bool))
    wei = jnp.where(tril, wei, -jnp.inf)
    wei = jax.nn.softmax(wei, axis=-1)
    return wei @ v


if __name__ == "__main__":
    # Shapes consistent with the module:
    #   n_embd (C) = 32, head_size (H) = 16, block_size = T = 8
    T, C, H = 8, 32, 16

    key = jax.random.PRNGKey(0)
    kx, kk, kq, kv = jax.random.split(key, 4)
    bound = 1.0 / math.sqrt(C)
    w_key = jax.random.uniform(kk, (H, C), jnp.float32, -bound, bound)
    w_query = jax.random.uniform(kq, (H, C), jnp.float32, -bound, bound)
    w_value = jax.random.uniform(kv, (H, C), jnp.float32, -bound, bound)

    # 1) f32 path (exact MXU semantics) vs. the f32 reference, tight tolerance.
    B = 2
    x = jax.random.normal(kx, (B, T, C), dtype=jnp.float32)
    out = jax.block_until_ready(head_forward(x, w_key, w_query, w_value))
    ref = head_reference(x, w_key, w_query, w_value)
    assert out.shape == (B, T, H), out.shape
    err = float(jnp.max(jnp.abs(out - ref)))
    assert jnp.allclose(out, ref, atol=1e-4, rtol=1e-4), err

    # 2) bf16 fast path (bf16-in / f32-acc MXU), grid=(2,) so the steps are
    #    pipelined and shardable across v7x's two TensorCores.  Loose
    #    tolerance accounts for bf16 rounding of inputs/weights/operands.
    B = 4
    xb = jax.random.normal(kx, (B, T, C), dtype=jnp.float32)
    out_bf = jax.block_until_ready(
        head_forward(xb.astype(jnp.bfloat16),
                     w_key.astype(jnp.bfloat16),
                     w_query.astype(jnp.bfloat16),
                     w_value.astype(jnp.bfloat16)))
    ref_bf = head_reference(xb, w_key, w_query, w_value)
    assert out_bf.shape == (B, T, H), out_bf.shape
    err_bf = float(jnp.max(jnp.abs(out_bf.astype(jnp.float32) - ref_bf)))
    assert err_bf < 8e-2, err_bf

    print("KERNEL_OK")
</pallas_src>

<mosaic_0001>
module attributes {stable_mosaic.version = 11 : i64} {
  func.func @_head_kernel(%arg0: i32, %arg1: memref<8x32xf32, #tpu.memory_space<vmem>>, %arg2: memref<32x384xf32, #tpu.memory_space<vmem>>, %arg3: memref<8x128xf32, #tpu.memory_space<vmem>>) attributes {dimension_semantics = [#tpu.dimension_semantics<parallel>], iteration_bounds = array<i64: 2>, scalar_prefetch = 0 : i64, scratch_operands = 0 : i64, tpu.core_type = #tpu.core_type<tc>, window_params = [{transform_indices = @transform_0, window_bounds = array<i64: 8, 32>}, {pipeline_mode = #tpu.pipeline_mode<synchronous>, transform_indices = @transform_1, window_bounds = array<i64: 32, 384>}, {transform_indices = @transform_2, window_bounds = array<i64: 8, 128>}]} {
    %c0 = arith.constant 0 : index
    %c0_0 = arith.constant 0 : index
    %0 = vector.load %arg1[%c0, %c0_0] : memref<8x32xf32, #tpu.memory_space<vmem>>, vector<8x32xf32>
    %c0_1 = arith.constant 0 : index
    %c0_2 = arith.constant 0 : index
    %1 = vector.load %arg2[%c0_1, %c0_2] : memref<32x384xf32, #tpu.memory_space<vmem>>, vector<32x384xf32>
    %cst = arith.constant dense<0.000000e+00> : vector<8x384xf32>
    %2 = tpu.matmul %0, %1, %cst {dimension_numbers = #tpu.dot_dimension_numbers<[1], [0], [0], [1], [0, 0, 1, 1], [], []>} : vector<8x32xf32>, vector<32x384xf32>, vector<8x384xf32> -> vector<8x384xf32>
    %3 = vector.extract_strided_slice %2 {offsets = [0, 0], sizes = [8, 128], strides = [1, 1]} : vector<8x384xf32> to vector<8x128xf32>
    %4 = vector.extract_strided_slice %2 {offsets = [0, 128], sizes = [8, 128], strides = [1, 1]} : vector<8x384xf32> to vector<8x128xf32>
    %5 = vector.extract_strided_slice %2 {offsets = [0, 256], sizes = [8, 128], strides = [1, 1]} : vector<8x384xf32> to vector<8x128xf32>
    %6 = vector.shape_cast %3 : vector<8x128xf32> to vector<1x8x128xf32>
    %7 = vector.shape_cast %4 : vector<8x128xf32> to vector<1x8x128xf32>
    %8 = vector.shape_cast %5 : vector<8x128xf32> to vector<1x8x128xf32>
    "tpu.trace_start"() <{level = 10 : i32, message = "bqh,bkh->bqk"}> : () -> ()
    %cst_3 = arith.constant dense<0.000000e+00> : vector<1x8x8xf32>
    %9 = tpu.matmul %7, %6, %cst_3 {dimension_numbers = #tpu.dot_dimension_numbers<[2], [2], [1], [1], [0, 0, 0, 1, 1, 1], [0], [0]>} : vector<1x8x128xf32>, vector<1x8x128xf32>, vector<1x8x8xf32> -> vector<1x8x8xf32>
    "tpu.trace_stop"() : () -> ()
    %10 = tpu.iota {dimensions = array<i32: 1>} : vector<1x8x8xi32>
    %11 = tpu.iota {dimensions = array<i32: 2>} : vector<1x8x8xi32>
    %12 = arith.cmpi sle, %11, %10 : vector<1x8x8xi32>
    %cst_4 = arith.constant -1.000000e+30 : f32
    %13 = vector.broadcast %cst_4 : f32 to vector<1x8x8xf32>
    %14 = arith.select %12, %9, %13 : vector<1x8x8xi1>, vector<1x8x8xf32>
    %cst_5 = arith.constant dense<0xFF800000> : vector<1x8xf32>
    %15 = vector.multi_reduction <maximumf>, %14, %cst_5 [2] : vector<1x8x8xf32> to vector<1x8xf32>
    %16 = vector.shape_cast %15 : vector<1x8xf32> to vector<1x8x1xf32>
    %17 = vector.broadcast %16 : vector<1x8x1xf32> to vector<1x8x8xf32>
    %18 = arith.subf %14, %17 : vector<1x8x8xf32>
    %19 = math.exp %18 : vector<1x8x8xf32>
    %cst_6 = arith.constant dense<0.000000e+00> : vector<1x8xf32>
    %20 = vector.multi_reduction <add>, %19, %cst_6 [2] : vector<1x8x8xf32> to vector<1x8xf32>
    %21 = vector.shape_cast %20 : vector<1x8xf32> to vector<1x8x1xf32>
    %22 = tpu.reciprocal %21 : vector<1x8x1xf32> -> vector<1x8x1xf32>
    %23 = vector.broadcast %22 : vector<1x8x1xf32> to vector<1x8x8xf32>
    %24 = arith.mulf %19, %23 : vector<1x8x8xf32>
    "tpu.trace_start"() <{level = 10 : i32, message = "bqk,bkh->bqh"}> : () -> ()
    %cst_7 = arith.constant dense<0.000000e+00> : vector<1x8x128xf32>
    %25 = tpu.matmul %24, %8, %cst_7 {dimension_numbers = #tpu.dot_dimension_numbers<[2], [1], [1], [2], [0, 0, 0, 1, 1, 2], [0], [0]>} : vector<1x8x8xf32>, vector<1x8x128xf32>, vector<1x8x128xf32> -> vector<1x8x128xf32>
    "tpu.trace_stop"() : () -> ()
    %26 = vector.shape_cast %25 : vector<1x8x128xf32> to vector<8x128xf32>
    %c0_8 = arith.constant 0 : index
    %c0_9 = arith.constant 0 : index
    %27 = vector.load %arg3[%c0_8, %c0_9] : memref<8x128xf32, #tpu.memory_space<vmem>>, vector<8x128xf32>
    tpu.vector_store %arg3[%c0_8, %c0_9], %26 {strides = array<i32>} : memref<8x128xf32, #tpu.memory_space<vmem>>, vector<8x128xf32>,
    return
  }
  func.func @transform_0(%arg0: i32) -> (i32, i32) {
    %c0_i32 = arith.constant 0 : i32
    %c0_i32_0 = arith.constant 0 : i32
    return %arg0, %c0_i32 : i32, i32
  }
  func.func @transform_1(%arg0: i32) -> (i32, i32) {
    %c0_i32 = arith.constant 0 : i32
    %c0_i32_0 = arith.constant 0 : i32
    %c0_i32_1 = arith.constant 0 : i32
    return %c0_i32, %c0_i32_0 : i32, i32
  }
  func.func @transform_2(%arg0: i32) -> (i32, i32) {
    %c0_i32 = arith.constant 0 : i32
    %c0_i32_0 = arith.constant 0 : i32
    return %arg0, %c0_i32 : i32, i32
  }
}

</mosaic_0001>

<bundles_post_ra>
// kernel: tpu_custom_call.1
= control target key start
LH: loop header
LB: loop body
LE: loop exit
PB: predicated region body
PF: predicated region fallthrough
CT: control target
= control target key end

     0   :  { %7 = vsyncpa [#allocation3], 0  ;;  %s1076_s0 = inlined_call_operand.hbm [shape: f32[16,32], index: 0, kind: input, shape index: {}]   ;;  %s1077_s1 = inlined_call_operand.hbm [shape: f32[32,384], index: 1, kind: input, shape index: {}]   ;;  %s1078_s2 = inlined_call_operand.hbm [shape: f32[16,128], index: 2, kind: output, shape index: {}]  }
   0x1   :  { %9 = vsyncpa [#allocation3 + $0x1], 0 }
   0x2   :  { %10 = vsyncpa [#allocation6], 0 }
   0x3   :  { %11 = vsyncpa [#allocation4], 0 }
   0x4   :  { %13 = vsyncpa [#allocation4 + $0x1], 0  ;;  %s868_s9 = smov 0   ;;  %s870_s10 = smov 0  }
   0x5   :  { %s872_s11 = smov 0   ;;  %s874_s12 = smov 0  }
   0x6 LB: > { %s889_s13 = sadd.s32 4294967295, %s843_s12   ;;  %s588_s14 = sadd.s32 4294967294, %s843_s12   ;;  %s843_s12 = sphi %s874_s12, %s1098_s12   ;;  %s839_s11 = sphi %s872_s11, %s1097_s11   ;;  %s835_s10 = sphi %s870_s10, %s1096_s10   ;;  %s831_s9 = sphi %s868_s9, %s1095_s9  }
   0x7   : > { %p39_p0 = scmp.ne.s32.totalorder %s835_s10, %s831_s9  ;;  %p1079_p1 = scmp.eq.s32.totalorder %s889_s13, 0 }
   0x8   : > { %p90_p3 = scmp.eq.s32.totalorder %s588_s14, 1  ;;  %p589_p5 = scmp.ge.s32.totalorder %s843_s12, 1 }
   0x9   : > { %p898_p4 = por %p1079_p1, %p39_p0  ;;  %p97_p7 = scmp.lt.s32.totalorder %s843_s12, 3 }
   0xa   : > { %p903_p6 = por %p90_p3, %p39_p0  ;;  %s845_s18 = smov [#allocation5]  }
   0xb   : > { %s1082_s15 = scalar_select %p898_p4, 1, 0 }
   0xc   : > { %s1083_s16 = scalar_select %p903_p6, 1, 0 }
   0xd   : > { %p908_p8 = pnand %p589_p5, %p97_p7  ;;  %s109_s19 = sshll.u32 %s845_s18, 4  ;;  %s912_s19 = int_to_ptr.vmem [resolvable:$true] %s109_s19 }
   0xe   : > { %s924_s21 = sadd.s32 1, %s843_s12   ;;  %s26_s22 = sadd.s32 1, %s839_s11 }
   0xf   : > { %s1084_s17 = scalar_select %p908_p8, 1, 0 }
  0x10   : > { %p657_p9 = pneg %p908_p8  ;;  %s23_s23 = ssub.s32 %s843_s12, %s924_s21 }
  0x11   : > { %s715_s26 = scalar_lea.hbm %s1077_s1, 1536 }
  0x12   : > { %p919_p11 = pnand %p657_p9, %p1079_p1  ;;  %p716_p12 = scmp.ne.s32.totalorder %s1077_s1, %s715_s26 }
  0x13   : > { %p722_p5 = scmp.lt.u32.totalorder %s715_s26, %s1077_s1 }
  0x14   : > { %p717_p13 = pneg %p919_p11 }
  0x16   : > { %p718_p0 = pnand %p717_p13, %p716_p12 }
  0x18   : > { %p719_p3 = pneg %p718_p0 }
  0x1a   : > { %p724_p7 = pnand %p722_p5, %p719_p3 }
  0x1c   : > { %727 = shalt.err (!%p724_p7)
}
  0x1d   : > { %s728_s3 = scalar_lea.vmem %s912_s19, 1536  ;;  %p736_p2 = scmp.lt.s32.totalorder %s912_s19, %s912_s19 }
  0x1e   : > { %p729_p9 = scmp.ne.s32.totalorder %s912_s19, %s728_s3  ;;  %p737_p6 = scmp.lt.s32.totalorder %s728_s3, %s728_s3 }
  0x20   : > { %p731_p10 = pnand %p729_p9, %p717_p13  ;;  %p738_p4 = por %p737_p6, %p736_p2 }
  0x22   : > { %p732_p1 = pneg %p731_p10 }
  0x24   : > { %p739_p8 = pnand %p738_p4, %p732_p1 }
  0x26   : > { %742 = shalt.err (!%p739_p8)
}
  0x27   : > { %s846_s4 = smov 384   ;;  %s847_s5 = smov 24  }
  0x28   : > { %660 = dma.hbm_to_vmem [thread:$0]  (!%p919_p11), %s1077_s1, 1536, %s912_s19, [#allocation6], %s846_s4, %s846_s4, %s847_s5  }
  0x29   : > { %p24_p2 = scmp.eq.s32.totalorder %s23_s23, 0  ;;  %p33_p1 = scmp.ne.s32.totalorder %s839_s11, %s835_s10 }
  0x2a   : > { %p34_p4 = scmp.eq.s32.totalorder %s843_s12, 0  ;;  %p670_p6 = scmp.lt.s32.totalorder %s843_s12, 2 }
  0x2b   : > { %s955_s8 = scalar_select %p24_p2, %s839_s11, %s26_s22  }
  0x2c   : > { %p35_p8 = por %p34_p4, %p33_p1  ;;  %p1086_p10 = scmp.eq.s32.totalorder %s889_s13, 1 }
  0x2d   : > { %s123_s18 = sand.u32 1, %s839_s11   ;;  %s593_s24 = sshll.u32 %s843_s12, 7 }
  0x2e   : > { %p959_p12 = por %p1086_p10, %p33_p1  ;;  %s592_s25 = sshll.u32 %s123_s18, 3 }
  0x2f   : > { %s968_s27 = scalar_lea.hbm %s1076_s0, %s593_s24  ;;  %s127_s19 = scalar_lea.vmem [#allocation2], %s592_s25 }
  0x30   : > { %s134_s22 = sshll.u32 %s127_s19, 4  ;;  %p970_p11 = pnand %p670_p6, %p35_p8  ;;  %s974_s22 = int_to_ptr.vmem [resolvable:$true] %s134_s22 }
  0x31   : > { %s124_s28 = scalar_lea.sflag [#allocation3], %s123_s18  ;;  %s743_s29 = scalar_lea.hbm %s968_s27, 128 }
  0x32   : > { %p744_p13 = scmp.ne.s32.totalorder %s968_s27, %s743_s29  ;;  %p745_p0 = pneg %p970_p11 }
  0x33   : > { %s748_s4 = scalar_lea.hbm %s1076_s0, 256  ;;  %p749_p7 = scmp.lt.u32.totalorder %s968_s27, %s1076_s0 }
  0x34   : > { %p746_p3 = pnand %p745_p0, %p744_p13  ;;  %p750_p9 = scmp.lt.u32.totalorder %s748_s4, %s743_s29 }
  0x35   : > { %p752_p1 = scmp.lt.u32.totalorder %s743_s29, %s968_s27 }
  0x36   : > { %p747_p5 = pneg %p746_p3  ;;  %p751_p2 = por %p750_p9, %p749_p7 }
  0x38   : > { %p753_p4 = por %p752_p1, %p751_p2 }
  0x3a   : > { %p754_p6 = pnand %p753_p4, %p747_p5 }
  0x3c   : > { %757 = shalt.err (!%p754_p6)
}
  0x3d   : > { %s758_s7 = scalar_lea.vmem %s974_s22, 128  ;;  %s848_s18 = smov [#allocation2]  }
  0x3e   : > { %p759_p8 = scmp.ne.s32.totalorder %s974_s22, %s758_s7  ;;  %s763_s24 = sshll.u32 %s848_s18, 4  ;;  %s764_s24 = int_to_ptr.vmem [resolvable:$false] %s763_s24 }
  0x3f   : > { %s765_s25 = scalar_lea.vmem %s764_s24, 256  ;;  %p766_p3 = scmp.lt.s32.totalorder %s974_s22, %s764_s24 }
  0x40   : > { %p761_p10 = pnand %p759_p8, %p745_p0  ;;  %p767_p7 = scmp.lt.s32.totalorder %s765_s25, %s758_s7 }
  0x42   : > { %p762_p13 = pneg %p761_p10  ;;  %p768_p9 = por %p767_p7, %p766_p3 }
  0x44   : > { %p769_p2 = pnand %p768_p9, %p762_p13 }
  0x46   : > { %772 = shalt.err (!%p769_p2)
}
  0x47   : > { %664 = dma.hbm_to_vmem [thread:$0]  (!%p970_p11), %s968_s27, 128, %s974_s22, %s124_s28  }
  0x48   : > { %p1089_p5 = scmp.ne.s32.totalorder %s1084_s17, 0 }
  0x49   : > { %s1004_s20 = sand.u32 (!%p1089_p5), 1, %s835_s10   ;;  %p1090_p0 = scmp.ne.s32.totalorder (!%p1089_p5), %s1082_s15, 0 }
  0x4a   : > { %143 = sbr.rel (%p1089_p5) target bundleno = 1064 (0x428), region = 28  ;;  %s595_s26 = sshll.u32 (!%p1089_p5), %s1004_s20, 3 }
  0x4b   : > { %s146_s19 = scalar_lea.sflag (!%p1089_p5), [#allocation3], %s1004_s20  ;;  %s149_s29 = scalar_lea.vmem (!%p1089_p5), [#allocation2], %s595_s26 }
  0x51   : > { %818 = dma.done.wait (%p1090_p0), %s146_s19, 128  }
  0x52   : > { %820 = vsyncadd (%p1090_p0), %s146_s19, 4294967168  ;;  %p1091_p11 = scmp.eq.s32.totalorder %s889_s13, 0 }
  0x54   : > { %822 = dma.done.wait (%p1091_p11), [#allocation6], 1536   ;;  %p1092_p1 = pmov %p1091_p11 }
  0x55   : > { %v849_v0 = vmov 0.0   ;;  %v176_v1 = vld [vmem:[#allocation5 + $0x8] sm:$0xff]  ;;  %v179_v2 = vld [vmem:[#allocation5 + $0x20] sm:$0xff]  ;;  %v178_v5 = vld [vmem:[#allocation5 + $0x18] sm:$0xff]  ;;  %vm187_vm0 = vcmask 261120   ;;  %vm850_vm1 = vmmov 0   ;;  %v402_v23 = vlaneseq }
  0x56   : > { %824 = vsyncadd (%p1092_p1), [#allocation6], 4294965760  ;;  %255 = vmatprep.mubr.f32.mxu0 %v849_v0  ;;  %v175_v3 = vld [vmem:[#allocation5] sm:$0xff]  ;;  %v635_v4 = vpack.c.bf16 %v179_v2, %v176_v1  ;;  %v182_v6 = vld [vmem:[#allocation5 + $0x38] sm:$0xff]  ;;  %622 = vmatprep.mubr.msk.f32.mxu1 %vm850_vm1, %v849_v0  ;;  %v851_v19 = vmov 0.0|0.0   ;;  %vm408_vm3 = vcmask 64512  }
  0x57   : > { %v185_v7 = vld [vmem:[#allocation5 + $0x50] sm:$0xff]  ;;  %v637_v8 = vpack.c.bf16 %v178_v5, %v175_v3  ;;  %v184_v11 = vld [vmem:[#allocation5 + $0x48] sm:$0xff]  ;;  %v183_v18 = vld [vmem:[#allocation5 + $0x40] sm:$0xff]  ;;  %643 = vmatprep.subr.bf16.mxu1 %v851_v19  ;;  %v403_v24 = vshrl.u32 %v402_v23, 7  ;;  %v405_v25 = vand.u32 127, %v402_v23  ;;  %s173_s15 = scalar_lea.vmem [#allocation7], %s595_s26 }
  0x58   : > { %v639_v9 = vpack.c.bf16 %v185_v7, %v182_v6  ;;  %v181_v10 = vld [vmem:[#allocation5 + $0x30] sm:$0xff]  ;;  %636 = vmatprep.subr.bf16.mxu0 %v635_v4  ;;  %v180_v17 = vld [vmem:[#allocation5 + $0x28] sm:$0xff]  ;;  %v186_v21 = vld [vmem:[#allocation5 + $0x58] sm:$0xff]  ;;  %s508_s17 = sshll.u32 %s173_s15, 4  ;;  %s602_s27 = sshll.u32 %s889_s13, 7  ;;  %s1029_s17 = int_to_ptr.vmem [resolvable:$true] %s508_s17 }
  0x59   : > { %638 = vmatpush1.bf16.msra.mxu0 %v637_v8  ;;  %v641_v12 = vpack.c.bf16 %v184_v11, %v181_v10  ;;  %v174_v13 = vld [vmem:[%s149_s29] sm:$0xff]  ;;  %v647_v22 = vpack.c.bf16 %v186_v21, %v183_v18  ;;  %vm406_vm2 = vcmp.le.s32.totalorder %v405_v25, %v403_v24  ;;  %s1034_s28 = scalar_lea.hbm %s1078_s2, %s602_s27  ;;  %s495_s30 = scalar_lea.sflag [#allocation4], %s1004_s20 }
  0x5a   : > { %640 = vmatprep.subr.bf16.mxu0 %v639_v9  ;;  %v177_v16 = vld [vmem:[#allocation5 + $0x10] sm:$0xff]  ;;  %s773_s3 = scalar_lea.vmem %s1029_s17, 128  ;;  %s852_s13 = smov [#allocation7]  }
  0x5b   : > { %v644_v20 = vpack.c.bf16 %v180_v17, %v177_v16  ;;  %p774_p4 = scmp.ne.s32.totalorder %s1029_s17, %s773_s3  ;;  %s777_s4 = sshll.u32 %s852_s13, 4  ;;  %s778_s4 = int_to_ptr.vmem [resolvable:$false] %s777_s4 }
  0x5c   : > { %s779_s5 = scalar_lea.vmem %s778_s4, 256  ;;  %p780_p10 = scmp.lt.s32.totalorder %s1029_s17, %s778_s4 }
  0x5d   : > { %642 = vmatpush1.bf16.msra.mxu0 %v641_v12  ;;  %645 = vmatpush3.bf16.msra.mxu1 %v644_v20  ;;  %p775_p6 = pnand %p774_p4, %p959_p12  ;;  %p781_p13 = scmp.lt.s32.totalorder %s779_s5, %s773_s3 }
  0x5e   : > { %625 = vmatprep.subr.mxu0 %v849_v0  ;;  %646 = vmatprep.subr.bf16.mxu1 %v851_v19 }
  0x5f   : > { %p776_p8 = pneg %p775_p6  ;;  %p782_p3 = por %p781_p13, %p780_p10 }
  0x60   : > { %598 = vmatmul.mubr.msk.f32.vlgmr.msra.gmra.mrb[0].mxu0 %vm187_vm0, %v174_v13 }
  0x61   : > { %627 = vmatprep.mubr.msk.f32.mxu0 %vm850_vm1, %v849_v0  ;;  %648 = vmatpush3.bf16.msra.mxu1 %v647_v22  ;;  %p783_p7 = pnand %p782_p3, %p776_p8 }
  0x62   : > { %630 = vmatprep.subr.mxu1 %v849_v0 }
  0x64   : > { %623 = vmatmul.mubr.msk.f32.vlgmr.msra.gmra.mrb[0].mxu1 %vm187_vm0, %v174_v13 }
  0x65   : > { %632 = vmatprep.mubr.msk.f32.mxu1 %vm850_vm1, %v849_v0 }
 0x133   : > { %v257_v14 = vpop.f32.mrb[0].mxu0 }
 0x134   : > { %v259_v15 = vpop.f32.mrb[1].mxu0  ;;  %626 = vmatpush3.xpose.msra.mxu0 %v257_v14 }
 0x137   : > { %628 = vmatmul.mubr.f32.vlgmr.msra.gmra.mrb[2].mxu0 %v259_v15  ;;  %v328_v35 = vpop.f32.mrb[0].mxu1 }
 0x138   : > { %v624_v36 = vpop.f32.mrb[1].mxu1  ;;  %631 = vmatpush3.msra.mxu1 %v328_v35 }
 0x20a   : > { %v398_v26 = vpop.f32.mrb[2].mxu0 }
 0x20b   : > { %v407_v27 = vsel %vm406_vm2, %v398_v26, -1e+30  ;;  %v629_v28 = vpop.f32.mrb[3].mxu0 }
 0x20c   : > { %v409_v29 = vsel %vm408_vm3, %v407_v27, -inf }
 0x20d   : > { %410 = vmax.xlane.f32.xlu0 %v409_v29 }
 0x29a   : > { %v411_v30 = vpop.xlane.xlu0 %410 }
 0x29b   : > { %v412_v31 = vsub.f32 %v407_v27, %v411_v30 }
 0x29d   : > { %v413_v32 = vmul.f32 1.442695, %v412_v31 }
 0x29f   : > { %711 = vpow2.f32 %v413_v32 }
 0x2a9   : > { %v712_v33 = vpop.eup %711 }
 0x2aa   : > { %v415_v34 = vsel %vm408_vm3, %v712_v33, 0.0 }
 0x2ab   : > { %416 = vadd.xlane.f32.xlu0 %v415_v34 }
 0x338   : > { %v417_v37 = vpop.xlane.xlu0 %416 }
 0x339   : > { %713 = vrcp.f32 %v417_v37 }
 0x343   : > { %v714_v38 = vpop.eup %713 }
 0x344   : > { %v419_v39 = vmul.f32 %v714_v38, %v712_v33 }
 0x346   : > { %633 = vmatmul.mubr.msk.f32.vlgmr.msra.gmra.mrb[2].mxu1 %vm408_vm3, %v419_v39 }
 0x419   : > { %v489_v40 = vpop.f32.mrb[2].mxu1 }
 0x41a   : > { %493 = vst [vmem:[%s173_s15] sm:$0xff] %v489_v40  ;;  %v634_v41 = vpop.f32.mrb[3].mxu1 }
 0x41b   : > { %786 = shalt.err (!%p783_p7)
}
 0x41c   : > { %s787_s6 = scalar_lea.hbm %s1034_s28, 128  ;;  %s791_s24 = scalar_lea.hbm %s1078_s2, 256 }
 0x41d   : > { %p788_p9 = scmp.ne.s32.totalorder %s1034_s28, %s787_s6  ;;  %p792_p0 = scmp.lt.u32.totalorder %s1034_s28, %s1078_s2 }
 0x41e   : > { %p793_p11 = scmp.lt.u32.totalorder %s791_s24, %s787_s6  ;;  %p795_p4 = scmp.lt.u32.totalorder %s787_s6, %s1034_s28 }
 0x41f   : > { %p789_p2 = pnand %p788_p9, %p959_p12 }
 0x420   : > { %p794_p1 = por %p793_p11, %p792_p0 }
 0x421   : > { %p790_p5 = pneg %p789_p2 }
 0x422   : > { %p796_p6 = por %p795_p4, %p794_p1 }
 0x424   : > { %p797_p8 = pnand %p796_p6, %p790_p5 }
 0x426   : > { %800 = shalt.err (!%p797_p8)
}
 0x427   : > { %655 = dma.vmem_to_hbm [thread:$0]  (%p959_p12), %s1029_s17, 128, %s1034_s28, %s495_s30  }
 0x428 PF: > { %s520_s26 = sand.u32 1, %s831_s9   ;;  %p1093_p10 = scmp.ne.s32.totalorder %s1083_s16, 0 }
 0x429   : > { %p1094_p13 = scmp.ge.s32.totalorder %s843_s12, 2  ;;  %s521_s19 = scalar_lea.sflag [#allocation4], %s520_s26 }
 0x42b   : > { %p666_p3 = pnand %p1094_p13, %p1093_p10 }
 0x42d   : > { %826 = dma.done.wait (!%p666_p3), %s521_s19, 128  }
 0x42e   : > { %828 = vsyncadd (!%p666_p3), %s521_s19, 4294967168  ;;  %p16_p7 = scmp.ge.s32.totalorder %s924_s21, 4   ;;  %s1095_s9 = smov %s835_s10 }
 0x42f   : > { %s1096_s10 = smov %s839_s11  ;;  %s1097_s11 = smov %s955_s8 }
 0x430   : > { %s1098_s12 = smov %s924_s21  ;;  %18 = sbr.rel (!%p16_p7) target bundleno = 6 (0x6), region = 77 }
 0x437   :  { %526 = vsyncpa [#allocation3], 1 }
 0x438   :  { %528 = vsyncpa [#allocation3 + $0x1], 1 }
 0x439   :  { %529 = vsyncpa [#allocation6], 1 }
 0x43a   :  { %530 = vsyncpa [#allocation4], 1 }
 0x43b   :  { %532 = vsyncpa [#allocation4 + $0x1], 1 }

</bundles_post_ra>
